<compile_context>
chip_gen: v5e
topology: v5e:2x2
jax: 0.10.0
libtpu: 0.0.40
codegen_flags: <defaults>
</compile_context>

<pallas_src>
import jax
import jax.numpy as jnp
from jax.experimental import pallas as pl
from jax.experimental.pallas import tpu as pltpu


def _cdiv(a, b):
    return -(-a // b)


def _round_up(x, m):
    return ((x + m - 1) // m) * m


def _num_tensorcores():
    """v7x has 2 TensorCores/chip sharding 'parallel' grid axes; v5e/v6e have 1."""
    try:
        kind = jax.devices()[0].device_kind.lower()
        if "v7" in kind:
            return 2
    except Exception:
        pass
    return 1


def _decima_gnn_kernel(x_ref, w_ref, b_ref, out_ref):
    # x_ref  : (TMP, pack*D_in)        packed block of input rows
    # w_ref  : (pack*D_in, pack*D_out) block-diagonal fused weight (grid-resident)
    # b_ref  : (1, pack*D_out)         fused bias (grid-resident)
    # out_ref: (TMP, pack*D_out)       lane-dense output block (128 lanes when packed)
    y = jnp.dot(x_ref[...], w_ref[...], preferred_element_type=jnp.float32)
    y = y + b_ref[...]
    # leaky_relu with PyTorch default negative_slope = 0.01
    out_ref[...] = jnp.where(y > 0, y, 0.01 * y).astype(out_ref.dtype)


def _forward_pallas(x_packed, w_k, b_k, *, tmp, pack, d_in, d_out, out_dtype, n_valid):
    n_p = x_packed.shape[0]
    d_in_p = pack * d_in
    d_out_p = pack * d_out
    itemsize = jnp.dtype(out_dtype).itemsize

    # True (unpadded) work for this call — advisory for XLA's scheduler.
    cost = pl.CostEstimate(
        flops=2 * n_valid * d_in * d_out + 2 * n_valid * d_out,
        transcendentals=0,
        bytes_accessed=n_valid * (d_in + d_out) * itemsize
        + int(w_k.size) * jnp.dtype(w_k.dtype).itemsize
        + int(b_k.size) * jnp.dtype(b_k.dtype).itemsize,
    )

    return pl.pallas_call(
        _decima_gnn_kernel,
        out_shape=jax.ShapeDtypeStruct((n_p, d_out_p), out_dtype),
        grid_spec=pl.GridSpec(
            grid=(_cdiv(n_p, tmp),),          # ragged last block handled by Pallas
            in_specs=[
                pl.BlockSpec((tmp, d_in_p), lambda i: (i, 0)),      # packed x rows
                pl.BlockSpec((d_in_p, d_out_p), lambda i: (0, 0)),  # fused W (resident)
                pl.BlockSpec((1, d_out_p), lambda i: (0, 0)),       # fused bias
            ],
            out_specs=pl.BlockSpec((tmp, d_out_p), lambda i: (i, 0)),
        ),
        compiler_params=pltpu.CompilerParams(
            dimension_semantics=("parallel",),
        ),
        cost_estimate=cost,
    )(x_packed, w_k, b_k)


def make_decima_gnn(w1, b1, w2, b2, *, tm_packed=512, mxu_dtype=None,
                    vmem_block_budget_bytes=3_500_000):
    """Build a jitted DecimaGNN forward. Cache the result per model (the fused /
    kron-packed weights are computed once here, not per call).

    w1: (D_in, 16), b1: (16,), w2: (16, D_out), b2: (D_out,)
    (weights are (in_features, out_features), i.e. transposed vs. PyTorch).
    Returns forward(x: (N, D_in)) -> (N, D_out).
    """
    # --- algebraic fusion (exact up to f32 reassociation: the module applies
    #     no nonlinearity between linear1 and linear2).
    w_f = jnp.dot(w1, w2)               # (D_in, D_out)
    b_f = jnp.dot(b1, w2) + b2          # (D_out,)
    d_in, d_out = int(w_f.shape[0]), int(w_f.shape[1])

    # --- lane-dense packing: fold `pack` consecutive nodes into one row so the
    #     output last dim is exactly 128 lanes (fully unmasked stores). Never
    #     pack wider than 128 — that only inflates the kron FLOP waste.
    pack = 128 // d_out if (0 < d_out < 128 and 128 % d_out == 0) else 1
    if pack > 1:
        w_k = jnp.kron(jnp.eye(pack, dtype=w_f.dtype), w_f)  # (pack*D_in, pack*D_out)
        b_k = jnp.tile(b_f, pack).reshape(1, pack * d_out)
    else:
        w_k = w_f
        b_k = b_f.reshape(1, d_out)
    if mxu_dtype is not None:
        # e.g. bf16 on v5e: keeps the kron-inflated matmul off the multi-pass
        # f32 MXU path (and halves streamed bytes). Loosens numerics ~1e-2 rel.
        w_k = w_k.astype(mxu_dtype)

    min_steps = 2 * _num_tensorcores()   # 2 on v5e/v6e, 4 on v7x
    d_in_p, d_out_p = pack * d_in, pack * d_out
    stream_dtype = jnp.dtype(mxu_dtype) if mxu_dtype is not None else jnp.dtype(w1.dtype)
    bytes_per_row = (d_in_p + d_out_p) * stream_dtype.itemsize

    def forward(x):
        n = x.shape[0]
        out_dtype = x.dtype
        n_p = _cdiv(n, pack)

        # Tiny graphs: the pallas_call fixed cost (grid setup, DMA descriptors,
        # ~600 cycles/step) exceeds the work; let XLA fuse the 3-op pipeline.
        if n_p < 32:
            y = x @ w_f + b_f
            return jnp.where(y > 0, y, 0.01 * y)

        # Row-tile: big enough to amortize per-grid-step overhead, >= min_steps
        # steps for DMA/compute overlap (and 2-TC sharding on v7x), and capped
        # so the double-buffered x+out block stays within the scoped-VMEM
        # default on every generation (v5e: 16 MiB).
        tmp = min(tm_packed, _round_up(max(_cdiv(n_p, min_steps), 1), 16))
        tmp = min(tmp, max(16, (vmem_block_budget_bytes // bytes_per_row) // 16 * 16))

        # Pad only to a multiple of `pack` (<= pack-1 rows, fused under jit);
        # the ragged last row-tile is handled by Pallas with masked edge I/O.
        n_pad = n_p * pack
        x_pad = x if n_pad == n else jnp.pad(x, ((0, n_pad - n), (0, 0)))
        x_packed = x_pad.reshape(n_p, d_in_p)   # row-major-compatible reshape
        if mxu_dtype is not None:
            x_packed = x_packed.astype(mxu_dtype)

        out_packed = _forward_pallas(
            x_packed, w_k, b_k,
            tmp=tmp, pack=pack, d_in=d_in, d_out=d_out,
            out_dtype=out_dtype, n_valid=n,
        )
        return out_packed.reshape(n_pad, d_out)[:n]

    return jax.jit(forward)


def decima_gnn_forward(x, w1, b1, w2, b2, **kwargs):
    """One-off convenience wrapper. For repeated calls, cache make_decima_gnn()."""
    return make_decima_gnn(w1, b1, w2, b2, **kwargs)(x)


def init_params(key, input_size, output_size, hidden=16, dtype=jnp.float32):
    """nn.Linear-style U(-1/sqrt(fan_in), 1/sqrt(fan_in)) init.

    Weights are (in_features, out_features), transposed vs. PyTorch.
    """
    k1, k2, k3, k4 = jax.random.split(key, 4)
    bound1 = 1.0 / jnp.sqrt(input_size)
    bound2 = 1.0 / jnp.sqrt(hidden)
    w1 = jax.random.uniform(k1, (input_size, hidden), dtype, -bound1, bound1)
    b1 = jax.random.uniform(k2, (hidden,), dtype, -bound1, bound1)
    w2 = jax.random.uniform(k3, (hidden, output_size), dtype, -bound2, bound2)
    b2 = jax.random.uniform(k4, (output_size,), dtype, -bound2, bound2)
    return w1, b1, w2, b2


def reference_forward(x, w1, b1, w2, b2):
    h = x @ w1 + b1
    y = h @ w2 + b2
    return jnp.where(y > 0, y, 0.01 * y)


if __name__ == "__main__":
    key = jax.random.PRNGKey(0)
    kx1, kx2, kp = jax.random.split(key, 3)

    input_size, output_size = 32, 8
    w1, b1, w2, b2 = init_params(kp, input_size, output_size)
    forward = make_decima_gnn(w1, b1, w2, b2)   # fused/kron weights cached here

    # --- Pallas path: N not a multiple of pack(=16) nor of the row tile,
    #     exercising the small pack-pad and the ragged last grid block.
    N = 1037
    x = jax.random.normal(kx1, (N, input_size), jnp.float32)
    out = jax.block_until_ready(forward(x))
    ref = reference_forward(x, w1, b1, w2, b2)
    assert out.shape == (N, output_size)
    # Fused (w1 @ w2) path differs from the two-matmul reference only by f32
    # reassociation rounding.
    assert jnp.allclose(out, ref, atol=1e-4, rtol=1e-4), "pallas path mismatch"

    # --- Tiny-graph XLA fallback path.
    N_small = 16
    xs = jax.random.normal(kx2, (N_small, input_size), jnp.float32)
    out_s = jax.block_until_ready(forward(xs))
    ref_s = reference_forward(xs, w1, b1, w2, b2)
    assert out_s.shape == (N_small, output_size)
    assert jnp.allclose(out_s, ref_s, atol=1e-4, rtol=1e-4), "fallback mismatch"

    print("KERNEL_OK")
</pallas_src>

<mosaic_0001>
module attributes {stable_mosaic.version = 11 : i64} {
  func.func @_decima_gnn_kernel(%arg0: i32, %arg1: memref<48x512xf32, #tpu.memory_space<vmem>>, %arg2: memref<512x128xf32, #tpu.memory_space<vmem>>, %arg3: memref<1x128xf32, #tpu.memory_space<vmem>>, %arg4: memref<48x128xf32, #tpu.memory_space<vmem>>) attributes {dimension_semantics = [#tpu.dimension_semantics<parallel>], iteration_bounds = array<i64: 2>, scalar_prefetch = 0 : i64, scratch_operands = 0 : i64, tpu.core_type = #tpu.core_type<tc>, window_params = [{transform_indices = @transform_0, window_bounds = array<i64: 48, 512>}, {pipeline_mode = #tpu.pipeline_mode<synchronous>, transform_indices = @transform_1, window_bounds = array<i64: 512, 128>}, {pipeline_mode = #tpu.pipeline_mode<synchronous>, transform_indices = @transform_2, window_bounds = array<i64: 1, 128>}, {transform_indices = @transform_3, window_bounds = array<i64: 48, 128>}]} {
    %c0 = arith.constant 0 : index
    %c0_0 = arith.constant 0 : index
    %0 = vector.load %arg1[%c0, %c0_0] : memref<48x512xf32, #tpu.memory_space<vmem>>, vector<48x512xf32>
    %c0_1 = arith.constant 0 : index
    %c0_2 = arith.constant 0 : index
    %1 = vector.load %arg2[%c0_1, %c0_2] : memref<512x128xf32, #tpu.memory_space<vmem>>, vector<512x128xf32>
    %cst = arith.constant dense<0.000000e+00> : vector<48x128xf32>
    %2 = tpu.matmul %0, %1, %cst {dimension_numbers = #tpu.dot_dimension_numbers<[1], [0], [0], [1], [0, 0, 1, 1], [], []>} : vector<48x512xf32>, vector<512x128xf32>, vector<48x128xf32> -> vector<48x128xf32>
    %c0_3 = arith.constant 0 : index
    %c0_4 = arith.constant 0 : index
    %3 = vector.load %arg3[%c0_3, %c0_4] : memref<1x128xf32, #tpu.memory_space<vmem>>, vector<1x128xf32>
    %4 = vector.broadcast %3 : vector<1x128xf32> to vector<48x128xf32>
    %5 = arith.addf %2, %4 : vector<48x128xf32>
    %cst_5 = arith.constant 0.000000e+00 : f32
    %6 = vector.broadcast %cst_5 : f32 to vector<48x128xf32>
    %7 = arith.cmpf ogt, %5, %6 : vector<48x128xf32>
    %cst_6 = arith.constant 0.00999999977 : f32
    %8 = vector.broadcast %cst_6 : f32 to vector<48x128xf32>
    %9 = arith.mulf %8, %5 : vector<48x128xf32>
    %10 = arith.select %7, %5, %9 : vector<48x128xi1>, vector<48x128xf32>
    %c0_7 = arith.constant 0 : index
    %c0_8 = arith.constant 0 : index
    %11 = vector.load %arg4[%c0_7, %c0_8] : memref<48x128xf32, #tpu.memory_space<vmem>>, vector<48x128xf32>
    tpu.vector_store %arg4[%c0_7, %c0_8], %10 {strides = array<i32>} : memref<48x128xf32, #tpu.memory_space<vmem>>, vector<48x128xf32>,
    return
  }
  func.func @transform_0(%arg0: i32) -> (i32, i32) {
    %c0_i32 = arith.constant 0 : i32
    %c0_i32_0 = arith.constant 0 : i32
    return %arg0, %c0_i32 : i32, i32
  }
  func.func @transform_1(%arg0: i32) -> (i32, i32) {
    %c0_i32 = arith.constant 0 : i32
    %c0_i32_0 = arith.constant 0 : i32
    %c0_i32_1 = arith.constant 0 : i32
    return %c0_i32, %c0_i32_0 : i32, i32
  }
  func.func @transform_2(%arg0: i32) -> (i32, i32) {
    %c0_i32 = arith.constant 0 : i32
    %c0_i32_0 = arith.constant 0 : i32
    %c0_i32_1 = arith.constant 0 : i32
    return %c0_i32, %c0_i32_0 : i32, i32
  }
  func.func @transform_3(%arg0: i32) -> (i32, i32) {
    %c0_i32 = arith.constant 0 : i32
    %c0_i32_0 = arith.constant 0 : i32
    return %arg0, %c0_i32 : i32, i32
  }
}

</mosaic_0001>

<bundles_post_ra>
// kernel: forward.1
= control target key start
LH: loop header
LB: loop body
LE: loop exit
PB: predicated region body
PF: predicated region fallthrough
CT: control target
= control target key end

     0   :  { %s919_s12 = smov 0   ;;  %s921_s13 = smov 0   ;;  %s1251_s0 = inlined_call_operand.vmem [shape: f32[65,512], index: 0, kind: input, shape index: {}]   ;;  %s1252_s1 = inlined_call_operand.vmem [shape: f32[512,128], index: 1, kind: input, shape index: {}]   ;;  %s1253_s2 = inlined_call_operand.vmem [shape: f32[1,128], index: 2, kind: input, shape index: {}]   ;;  %s1254_s3 = inlined_call_operand.vmem [shape: f32[65,128], index: 3, kind: output, shape index: {}]  }
   0x1   :  { %s923_s14 = smov 0  }
   0x2 LB: > { %s932_s15 = sadd.s32 4294967295, %s865_s14   ;;  %s934_s16 = sadd.s32 1, %s865_s14   ;;  %s865_s14 = sphi %s923_s14, %s1261_s14   ;;  %s861_s13 = sphi %s921_s13, %s1260_s13   ;;  %s857_s12 = sphi %s919_s12, %s1259_s12  }
   0x3   : > { %s85_s17 = ssub.s32 %s865_s14, %s934_s16  ;;  %s88_s18 = sadd.s32 1, %s861_s13 }
   0x4   : > { %p86_p0 = scmp.eq.s32.totalorder %s85_s17, 0  ;;  %p98_p1 = scmp.ne.s32.totalorder %s861_s13, %s857_s12 }
   0x5   : > { %p99_p2 = scmp.eq.s32.totalorder %s932_s15, 1  ;;  %p697_p3 = scmp.ge.s32.totalorder %s865_s14, 1 }
   0x6   : > { %s942_s19 = scalar_select %p86_p0, %s861_s13, %s88_s18  }
   0x7   : > { %p944_p4 = por %p99_p2, %p98_p1  ;;  %p149_p5 = scmp.lt.s32.totalorder %s865_s14, 3 }
   0x9   : > { %p150_p6 = pnand %p697_p3, %p149_p5 }
   0xa   : > { %s1033_s8 = smul.u32 (!%p150_p6), 6, %s932_s15  ;;  %s175_s7 = sand.u32 (!%p150_p6), 1, %s857_s12  }
   0xb   : > { %153 = sbr.rel (%p150_p6) target bundleno = 283 (0x11b), region = 32 }
   0xc   : > { %p184_p7 = scmp.lt.s32.totalorder (!%p150_p6), %s1033_s8, 8  ;;  %s714_s9 = smul.u32 (!%p150_p6), 48, %s175_s7 }
   0xe   : > { %s1183_s10 = scalar_lea.vmem (!%p150_p6), [#allocation2], %s714_s9  }
  0x10   : > { %v271_v0 = vld [vmem:[%s1252_s1 + $0x178] sm:$0xff]  ;;  %v270_v2 = vld [vmem:[%s1252_s1 + $0x170] sm:$0xff]  ;;  %v269_v6 = vld [vmem:[%s1252_s1 + $0x168] sm:$0xff]  ;;  %s1087_s27 = scalar_select %p184_p7, %s1033_s8, 8 }
  0x11   : > { %v239_v1 = vld [vmem:[%s1252_s1 + $0x78] sm:$0xff]  ;;  %362 = vmatpush.msra.mxu2 %v271_v0  ;;  %v238_v4 = vld [vmem:[%s1252_s1 + $0x70] sm:$0xff]  ;;  %v237_v8 = vld [vmem:[%s1252_s1 + $0x68] sm:$0xff]  ;;  %s464_s12 = ssub.s32 (%p944_p4), 9, %s1033_s8  ;;  %s713_s11 = smul.u32 (%p944_p4), 48, %s932_s15 }
  0x12   : > { %292 = vmatpush.msra.mxu0 %v239_v1  ;;  %v287_v3 = vld [vmem:[%s1252_s1 + $0x1f8] sm:$0xff]  ;;  %v286_v7 = vld [vmem:[%s1252_s1 + $0x1f0] sm:$0xff]  ;;  %v285_v10 = vld [vmem:[%s1252_s1 + $0x1e8] sm:$0xff]  ;;  %s712_s24 = sshll.u32 %s1087_s27, 5  ;;  %p465_p8 = scmp.lt.s32.totalorder (%p944_p4), %s464_s12, 6 }
  0x13   : > { %v255_v5 = vld [vmem:[%s1252_s1 + $0xf8] sm:$0xff]  ;;  %397 = vmatpush.msra.mxu3 %v287_v3  ;;  %363 = vmatpush.msra.mxu2 %v270_v2  ;;  %v254_v9 = vld [vmem:[%s1252_s1 + $0xf0] sm:$0xff]  ;;  %v268_v11 = vld [vmem:[%s1252_s1 + $0x160] sm:$0xff]  ;;  %s1135_s17 = scalar_lea.vmem %s1251_s0, %s712_s24  ;;  %s1198_s18 = scalar_lea.vmem (%p944_p4), %s1254_s3, %s713_s11  }
  0x14   : > { %327 = vmatpush.msra.mxu1 %v255_v5  ;;  %293 = vmatpush.msra.mxu0 %v238_v4  ;;  %v236_v12 = vld [vmem:[%s1252_s1 + $0x60] sm:$0xff]  ;;  %v253_v13 = vld [vmem:[%s1252_s1 + $0xe8] sm:$0xff]  ;;  %v267_v16 = vld [vmem:[%s1252_s1 + $0x158] sm:$0xff] }
  0x15   : > { %398 = vmatpush.msra.mxu3 %v286_v7  ;;  %364 = vmatpush.msra.mxu2 %v269_v6  ;;  %v284_v14 = vld [vmem:[%s1252_s1 + $0x1e0] sm:$0xff]  ;;  %v235_v17 = vld [vmem:[%s1252_s1 + $0x58] sm:$0xff]  ;;  %v266_v20 = vld [vmem:[%s1252_s1 + $0x150] sm:$0xff] }
  0x16   : > { %328 = vmatpush.msra.mxu1 %v254_v9  ;;  %294 = vmatpush.msra.mxu0 %v237_v8  ;;  %v252_v15 = vld [vmem:[%s1252_s1 + $0xe0] sm:$0xff]  ;;  %v283_v18 = vld [vmem:[%s1252_s1 + $0x1d8] sm:$0xff]  ;;  %v234_v21 = vld [vmem:[%s1252_s1 + $0x50] sm:$0xff] }
  0x17   : > { %399 = vmatpush.msra.mxu3 %v285_v10  ;;  %365 = vmatpush.msra.mxu2 %v268_v11  ;;  %v251_v19 = vld [vmem:[%s1252_s1 + $0xd8] sm:$0xff]  ;;  %v282_v22 = vld [vmem:[%s1252_s1 + $0x1d0] sm:$0xff]  ;;  %v265_v24 = vld [vmem:[%s1252_s1 + $0x148] sm:$0xff] }
  0x18   : > { %329 = vmatpush.msra.mxu1 %v253_v13  ;;  %295 = vmatpush.msra.mxu0 %v236_v12  ;;  %v250_v23 = vld [vmem:[%s1252_s1 + $0xd0] sm:$0xff]  ;;  %v233_v25 = vld [vmem:[%s1252_s1 + $0x48] sm:$0xff]  ;;  %v264_v28 = vld [vmem:[%s1252_s1 + $0x140] sm:$0xff] }
  0x19   : > { %400 = vmatpush.msra.mxu3 %v284_v14  ;;  %366 = vmatpush.msra.mxu2 %v267_v16  ;;  %v281_v26 = vld [vmem:[%s1252_s1 + $0x1c8] sm:$0xff]  ;;  %v232_v29 = vld [vmem:[%s1252_s1 + $0x40] sm:$0xff]  ;;  %v263_v32 = vld [vmem:[%s1252_s1 + $0x138] sm:$0xff] }
  0x1a   : > { %330 = vmatpush.msra.mxu1 %v252_v15  ;;  %296 = vmatpush.msra.mxu0 %v235_v17  ;;  %v249_v27 = vld [vmem:[%s1252_s1 + $0xc8] sm:$0xff]  ;;  %v280_v30 = vld [vmem:[%s1252_s1 + $0x1c0] sm:$0xff]  ;;  %v231_v33 = vld [vmem:[%s1252_s1 + $0x38] sm:$0xff] }
  0x1b   : > { %401 = vmatpush.msra.mxu3 %v283_v18  ;;  %367 = vmatpush.msra.mxu2 %v266_v20  ;;  %v248_v31 = vld [vmem:[%s1252_s1 + $0xc0] sm:$0xff]  ;;  %v279_v34 = vld [vmem:[%s1252_s1 + $0x1b8] sm:$0xff]  ;;  %v262_v36 = vld [vmem:[%s1252_s1 + $0x130] sm:$0xff] }
  0x1c   : > { %331 = vmatpush.msra.mxu1 %v251_v19  ;;  %297 = vmatpush.msra.mxu0 %v234_v21  ;;  %v247_v35 = vld [vmem:[%s1252_s1 + $0xb8] sm:$0xff]  ;;  %v230_v37 = vld [vmem:[%s1252_s1 + $0x30] sm:$0xff]  ;;  %v261_v40 = vld [vmem:[%s1252_s1 + $0x128] sm:$0xff] }
  0x1d   : > { %402 = vmatpush.msra.mxu3 %v282_v22  ;;  %368 = vmatpush.msra.mxu2 %v265_v24  ;;  %v278_v38 = vld [vmem:[%s1252_s1 + $0x1b0] sm:$0xff]  ;;  %v229_v41 = vld [vmem:[%s1252_s1 + $0x28] sm:$0xff]  ;;  %v260_v44 = vld [vmem:[%s1252_s1 + $0x120] sm:$0xff] }
  0x1e   : > { %332 = vmatpush.msra.mxu1 %v250_v23  ;;  %298 = vmatpush.msra.mxu0 %v233_v25  ;;  %v246_v39 = vld [vmem:[%s1252_s1 + $0xb0] sm:$0xff]  ;;  %v277_v42 = vld [vmem:[%s1252_s1 + $0x1a8] sm:$0xff]  ;;  %v228_v45 = vld [vmem:[%s1252_s1 + $0x20] sm:$0xff] }
  0x1f   : > { %403 = vmatpush.msra.mxu3 %v281_v26  ;;  %369 = vmatpush.msra.mxu2 %v264_v28  ;;  %v245_v43 = vld [vmem:[%s1252_s1 + $0xa8] sm:$0xff]  ;;  %v276_v46 = vld [vmem:[%s1252_s1 + $0x1a0] sm:$0xff]  ;;  %v259_v48 = vld [vmem:[%s1252_s1 + $0x118] sm:$0xff] }
  0x20   : > { %333 = vmatpush.msra.mxu1 %v249_v27  ;;  %299 = vmatpush.msra.mxu0 %v232_v29  ;;  %v244_v47 = vld [vmem:[%s1252_s1 + $0xa0] sm:$0xff]  ;;  %v227_v49 = vld [vmem:[%s1252_s1 + $0x18] sm:$0xff]  ;;  %v258_v52 = vld [vmem:[%s1252_s1 + $0x110] sm:$0xff] }
  0x21   : > { %404 = vmatpush.msra.mxu3 %v280_v30  ;;  %370 = vmatpush.msra.mxu2 %v263_v32  ;;  %v275_v50 = vld [vmem:[%s1252_s1 + $0x198] sm:$0xff]  ;;  %v226_v53 = vld [vmem:[%s1252_s1 + $0x10] sm:$0xff]  ;;  %v257_v56 = vld [vmem:[%s1252_s1 + $0x108] sm:$0xff] }
  0x22   : > { %334 = vmatpush.msra.mxu1 %v248_v31  ;;  %300 = vmatpush.msra.mxu0 %v231_v33  ;;  %v243_v51 = vld [vmem:[%s1252_s1 + $0x98] sm:$0xff]  ;;  %v274_v54 = vld [vmem:[%s1252_s1 + $0x190] sm:$0xff]  ;;  %v225_v57 = vld [vmem:[%s1252_s1 + $0x8] sm:$0xff] }
  0x23   : > { %405 = vmatpush.msra.mxu3 %v279_v34  ;;  %371 = vmatpush.msra.mxu2 %v262_v36  ;;  %v242_v55 = vld [vmem:[%s1252_s1 + $0x90] sm:$0xff]  ;;  %v273_v58 = vld [vmem:[%s1252_s1 + $0x188] sm:$0xff]  ;;  %v256_v60 = vld [vmem:[%s1252_s1 + $0x100] sm:$0xff] }
  0x24   : > { %335 = vmatpush.msra.mxu1 %v247_v35  ;;  %301 = vmatpush.msra.mxu0 %v230_v37  ;;  %v241_v59 = vld [vmem:[%s1252_s1 + $0x88] sm:$0xff]  ;;  %v224_v61 = vld [vmem:[%s1252_s1] sm:$0xff]  ;;  %v202_v62 = vld [vmem:[%s1135_s17 + $0x10] sm:$0xff] }
  0x25   : > { %406 = vmatpush.msra.mxu3 %v278_v38  ;;  %372 = vmatpush.msra.mxu2 %v261_v40  ;;  %v272_v63 = vld [vmem:[%s1252_s1 + $0x180] sm:$0xff]  ;;  %v203_v1 = vld [vmem:[%s1135_s17 + $0x18] sm:$0xff]  ;;  %v201_v3 = vld [vmem:[%s1135_s17 + $0x8] sm:$0xff] }
  0x26   : > { %336 = vmatpush.msra.mxu1 %v246_v39  ;;  %302 = vmatpush.msra.mxu0 %v229_v41  ;;  %v200_v0 = vld [vmem:[%s1135_s17] sm:$0xff]  ;;  %v206_v4 = vld [vmem:[%s1135_s17 + $0x30] sm:$0xff]  ;;  %v207_v6 = vld [vmem:[%s1135_s17 + $0x38] sm:$0xff] }
  0x27   : > { %407 = vmatpush.msra.mxu3 %v277_v42  ;;  %373 = vmatpush.msra.mxu2 %v260_v44  ;;  %v240_v2 = vld [vmem:[%s1252_s1 + $0x80] sm:$0xff]  ;;  %v205_v7 = vld [vmem:[%s1135_s17 + $0x28] sm:$0xff]  ;;  %v210_v8 = vld [vmem:[%s1135_s17 + $0x50] sm:$0xff] }
  0x28   : > { %337 = vmatpush.msra.mxu1 %v245_v43  ;;  %303 = vmatpush.msra.mxu0 %v228_v45  ;;  %v204_v5 = vld [vmem:[%s1135_s17 + $0x20] sm:$0xff]  ;;  %v211_v10 = vld [vmem:[%s1135_s17 + $0x58] sm:$0xff]  ;;  %v209_v11 = vld [vmem:[%s1135_s17 + $0x48] sm:$0xff] }
  0x29   : > { %408 = vmatpush.msra.mxu3 %v276_v46  ;;  %374 = vmatpush.msra.mxu2 %v259_v48  ;;  %v208_v9 = vld [vmem:[%s1135_s17 + $0x40] sm:$0xff]  ;;  %v214_v12 = vld [vmem:[%s1135_s17 + $0x70] sm:$0xff]  ;;  %v215_v14 = vld [vmem:[%s1135_s17 + $0x78] sm:$0xff] }
  0x2a   : > { %338 = vmatpush.msra.mxu1 %v244_v47  ;;  %304 = vmatpush.msra.mxu0 %v227_v49  ;;  %v212_v13 = vld [vmem:[%s1135_s17 + $0x60] sm:$0xff]  ;;  %v213_v15 = vld [vmem:[%s1135_s17 + $0x68] sm:$0xff]  ;;  %v218_v16 = vld [vmem:[%s1135_s17 + $0x90] sm:$0xff] }
  0x2b   : > { %409 = vmatpush.msra.mxu3 %v275_v50  ;;  %375 = vmatpush.msra.mxu2 %v258_v52  ;;  %v216_v17 = vld [vmem:[%s1135_s17 + $0x80] sm:$0xff]  ;;  %v219_v18 = vld [vmem:[%s1135_s17 + $0x98] sm:$0xff]  ;;  %v217_v19 = vld [vmem:[%s1135_s17 + $0x88] sm:$0xff] }
  0x2c   : > { %339 = vmatpush.msra.mxu1 %v243_v51  ;;  %305 = vmatpush.msra.mxu0 %v226_v53  ;;  %v222_v20 = vld [vmem:[%s1135_s17 + $0xb0] sm:$0xff]  ;;  %v220_v21 = vld [vmem:[%s1135_s17 + $0xa0] sm:$0xff]  ;;  %v223_v22 = vld [vmem:[%s1135_s17 + $0xb8] sm:$0xff] }
  0x2d   : > { %410 = vmatpush.msra.mxu3 %v274_v54  ;;  %376 = vmatpush.msra.mxu2 %v257_v56  ;;  %v221_v23 = vld [vmem:[%s1135_s17 + $0xa8] sm:$0xff]  ;;  %v804_v24 = vld [vmem:[%s1253_s2] ss:$0 sm:$0xff] }
  0x2e   : > { %340 = vmatpush.msra.mxu1 %v242_v55  ;;  %306 = vmatpush.msra.mxu0 %v225_v57 }
  0x2f   : > { %411 = vmatpush.msra.mxu3 %v273_v58  ;;  %377 = vmatpush.msra.mxu2 %v256_v60 }
  0x30   : > { %341 = vmatpush.msra.mxu1 %v241_v59  ;;  %307 = vmatpush.msra.mxu0 %v224_v61 }
  0x31   : > { %378 = vmatmul.f32.vlgmr.msra.gmra.mxu2 %v202_v62  ;;  %412 = vmatpush.msra.mxu3 %v272_v63 }
  0x32   : > { %308 = vmatmul.f32.vlgmr.msra.gmra.mxu0 %v200_v0  ;;  %413 = vmatmul.f32.vlgmr.msra.gmra.mxu3 %v203_v1 }
  0x33   : > { %342 = vmatpush.msra.mxu1 %v240_v2 }
  0x34   : > { %343 = vmatmul.f32.vlgmr.msra.gmra.mxu1 %v201_v3 }
  0x39   : > { %381 = vmatmul.f32.gmra.mxu2 %v206_v4 }
  0x3a   : > { %311 = vmatmul.f32.gmra.mxu0 %v204_v5  ;;  %416 = vmatmul.f32.gmra.mxu3 %v207_v6 }
  0x3c   : > { %346 = vmatmul.f32.gmra.mxu1 %v205_v7 }
  0x41   : > { %384 = vmatmul.f32.gmra.mxu2 %v210_v8 }
  0x42   : > { %314 = vmatmul.f32.gmra.mxu0 %v208_v9  ;;  %419 = vmatmul.f32.gmra.mxu3 %v211_v10 }
  0x44   : > { %349 = vmatmul.f32.gmra.mxu1 %v209_v11 }
  0x49   : > { %387 = vmatmul.f32.gmra.mxu2 %v214_v12 }
  0x4a   : > { %317 = vmatmul.f32.gmra.mxu0 %v212_v13  ;;  %422 = vmatmul.f32.gmra.mxu3 %v215_v14 }
  0x4c   : > { %352 = vmatmul.f32.gmra.mxu1 %v213_v15 }
  0x51   : > { %390 = vmatmul.f32.gmra.mxu2 %v218_v16 }
  0x52   : > { %320 = vmatmul.f32.gmra.mxu0 %v216_v17  ;;  %425 = vmatmul.f32.gmra.mxu3 %v219_v18 }
  0x54   : > { %355 = vmatmul.f32.gmra.mxu1 %v217_v19 }
  0x59   : > { %393 = vmatmul.f32.gmra.mxu2 %v222_v20 }
  0x5a   : > { %323 = vmatmul.f32.gmra.mxu0 %v220_v21  ;;  %428 = vmatmul.f32.gmra.mxu3 %v223_v22 }
  0x5c   : > { %358 = vmatmul.f32.gmra.mxu1 %v221_v23 }
  0xaf   : > { %v309_v25 = vpop.f32.mrf.mxu0 }
  0xb0   : > { %v310_v26 = vadd.f32 %v804_v24, %v309_v25 }
  0xb1   : > { %v344_v27 = vpop.f32.mrf.mxu1 }
  0xb2   : > { %v345_v28 = vadd.f32 %v344_v27, %v310_v26 }
  0xb4   : > { %v379_v29 = vpop.f32.mrf.mxu2 }
  0xb5   : > { %v380_v30 = vadd.f32 %v379_v29, %v345_v28  ;;  %v414_v31 = vpop.f32.mrf.mxu3 }
  0xb7   : > { %v415_v32 = vadd.f32 %v414_v31, %v380_v30  ;;  %v312_v33 = vpop.f32.mrf.mxu0 }
  0xb8   : > { %v313_v34 = vadd.f32 %v804_v24, %v312_v33 }
  0xb9   : > { %vm432_vm0 = vcmp.gt.f32.partialorder %v415_v32, 0.0  ;;  %v438_v35 = vmul.f32 0.01, %v415_v32  ;;  %v347_v36 = vpop.f32.mrf.mxu1 }
  0xba   : > { %v348_v37 = vadd.f32 %v347_v36, %v313_v34 }
  0xbb   : > { %v444_v38 = vsel %vm432_vm0, %v415_v32, %v438_v35 }
  0xbc   : > { %450 = vst [vmem:[%s1183_s10] sm:$0xff] %v444_v38  ;;  %v382_v39 = vpop.f32.mrf.mxu2 }
  0xbd   : > { %v383_v40 = vadd.f32 %v382_v39, %v348_v37  ;;  %v417_v41 = vpop.f32.mrf.mxu3 }
  0xbf   : > { %v418_v42 = vadd.f32 %v417_v41, %v383_v40  ;;  %v315_v43 = vpop.f32.mrf.mxu0 }
  0xc0   : > { %v316_v44 = vadd.f32 %v804_v24, %v315_v43 }
  0xc1   : > { %vm433_vm1 = vcmp.gt.f32.partialorder %v418_v42, 0.0  ;;  %v439_v45 = vmul.f32 0.01, %v418_v42  ;;  %v350_v46 = vpop.f32.mrf.mxu1 }
  0xc2   : > { %v351_v47 = vadd.f32 %v350_v46, %v316_v44 }
  0xc3   : > { %v445_v48 = vsel %vm433_vm1, %v418_v42, %v439_v45 }
  0xc4   : > { %451 = vst [vmem:[%s1183_s10 + $0x8] sm:$0xff] %v445_v48  ;;  %v385_v49 = vpop.f32.mrf.mxu2 }
  0xc5   : > { %v386_v50 = vadd.f32 %v385_v49, %v351_v47  ;;  %v420_v51 = vpop.f32.mrf.mxu3 }
  0xc7   : > { %v421_v52 = vadd.f32 %v420_v51, %v386_v50  ;;  %v318_v53 = vpop.f32.mrf.mxu0 }
  0xc8   : > { %v319_v54 = vadd.f32 %v804_v24, %v318_v53 }
  0xc9   : > { %vm434_vm2 = vcmp.gt.f32.partialorder %v421_v52, 0.0  ;;  %v440_v55 = vmul.f32 0.01, %v421_v52  ;;  %v353_v56 = vpop.f32.mrf.mxu1 }
  0xca   : > { %v354_v57 = vadd.f32 %v353_v56, %v319_v54 }
  0xcb   : > { %v446_v58 = vsel %vm434_vm2, %v421_v52, %v440_v55 }
  0xcc   : > { %452 = vst [vmem:[%s1183_s10 + $0x10] sm:$0xff] %v446_v58  ;;  %v388_v59 = vpop.f32.mrf.mxu2 }
  0xcd   : > { %v389_v60 = vadd.f32 %v388_v59, %v354_v57  ;;  %v423_v61 = vpop.f32.mrf.mxu3 }
  0xcf   : > { %v424_v62 = vadd.f32 %v423_v61, %v389_v60  ;;  %v321_v63 = vpop.f32.mrf.mxu0 }
  0xd0   : > { %v322_v0 = vadd.f32 %v804_v24, %v321_v63 }
  0xd1   : > { %vm435_vm3 = vcmp.gt.f32.partialorder %v424_v62, 0.0  ;;  %v441_v1 = vmul.f32 0.01, %v424_v62  ;;  %v356_v2 = vpop.f32.mrf.mxu1 }
  0xd2   : > { %v357_v3 = vadd.f32 %v356_v2, %v322_v0 }
  0xd3   : > { %v447_v4 = vsel %vm435_vm3, %v424_v62, %v441_v1 }
  0xd4   : > { %453 = vst [vmem:[%s1183_s10 + $0x18] sm:$0xff] %v447_v4  ;;  %v391_v5 = vpop.f32.mrf.mxu2 }
  0xd5   : > { %v392_v6 = vadd.f32 %v391_v5, %v357_v3  ;;  %v426_v7 = vpop.f32.mrf.mxu3 }
  0xd7   : > { %v427_v8 = vadd.f32 %v426_v7, %v392_v6  ;;  %v324_v9 = vpop.f32.mrf.mxu0 }
  0xd8   : > { %v325_v10 = vadd.f32 %v804_v24, %v324_v9 }
  0xd9   : > { %vm436_vm4 = vcmp.gt.f32.partialorder %v427_v8, 0.0  ;;  %v442_v11 = vmul.f32 0.01, %v427_v8  ;;  %v359_v12 = vpop.f32.mrf.mxu1 }
  0xda   : > { %v360_v13 = vadd.f32 %v359_v12, %v325_v10 }
  0xdb   : > { %v448_v14 = vsel %vm436_vm4, %v427_v8, %v442_v11 }
  0xdc   : > { %454 = vst [vmem:[%s1183_s10 + $0x20] sm:$0xff] %v448_v14  ;;  %v394_v15 = vpop.f32.mrf.mxu2 }
  0xdd   : > { %v395_v16 = vadd.f32 %v394_v15, %v360_v13  ;;  %v429_v17 = vpop.f32.mrf.mxu3 }
  0xdf   : > { %v430_v18 = vadd.f32 %v429_v17, %v395_v16 }
  0xe0   : > { %462 = sbr.rel (!%p944_p4) target bundleno = 283 (0x11b), region = 36 }
  0xe1   : > { %vm437_vm5 = vcmp.gt.f32.partialorder %v430_v18, 0.0  ;;  %v443_v19 = vmul.f32 0.01, %v430_v18 }
  0xe3   : > { %v449_v20 = vsel %vm437_vm5, %v430_v18, %v443_v19 }
  0xe4   : > { %455 = vst [vmem:[%s1183_s10 + $0x28] sm:$0xff] %v449_v20 }
  0xe5   : > { %s1263_s12 = smov (!%p465_p8, %s464_s12), 6 }
  0xe6   : > { %s700_s21 = sshll.u32 %s1263_s12, 3 }
  0xe7   : > { %p703_p9 = scmp.eq.s32.totalorder %s700_s21, 0 }
  0xe8   : > { %805 = sdivrem.u32 (!%p703_p9), %s1263_s12, 6 }
  0xe9   : > { %473 = sbr.rel (%p703_p9) target bundleno = 283 (0x11b), region = 40 }
  0xf1   : > { %s1204_s20 = spop.drf %805 }
  0xf2   : > { %s807_s22 = spop.drf %805  ;;  %p704_p10 = scmp.le.s32.totalorder %s1204_s20, 0 }
  0xf3   : > { %s1256_s15 = smov (!%p704_p10), %s1198_s18  ;;  %s1257_s8 = smov (!%p704_p10), %s1183_s10 }
  0xf4   : > { %650 = sbr.rel (%p704_p10) target bundleno = 257 (0x101), region = 116  ;;  %s1213_s23 = smov (!%p704_p10), 0  }
  0xf5   : > { %s1215_s25 = smov (!%p704_p10), 0  }
  0xf9 LB: >> { %v548_v21 = vld [vmem:[%s873_s8] sm:$0xff]  ;;  %v550_v22 = vld [vmem:[%s873_s8 + $0x8] sm:$0xff]  ;;  %v552_v23 = vld [vmem:[%s873_s8 + $0x10] sm:$0xff]  ;;  %s560_s26 = sadd.s32 1, %s877_s23  ;;  %s542_s25 = sadd.s32 1, %s881_s25   ;;  %s881_s25 = sphi %s1215_s25, %s542_s25   ;;  %s877_s23 = sphi %s1213_s23, %s1258_s23   ;;  %s873_s8 = sphi %s1257_s8, %s565_s8   ;;  %s869_s15 = sphi %s1256_s15, %s566_s15  }
  0xfa   : >> { %549 = vst [vmem:[%s869_s15] sm:$0xff] %v548_v21  ;;  %v554_v24 = vld [vmem:[%s873_s8 + $0x18] sm:$0xff]  ;;  %p561_p11 = scmp.ge.s32.totalorder %s560_s26, %s1204_s20  ;;  %v556_v25 = vld [vmem:[%s873_s8 + $0x20] sm:$0xff]  ;;  %v558_v26 = vld [vmem:[%s873_s8 + $0x28] sm:$0xff]  ;;  %p541_p12 = scmp.ge.s32.totalorder %s542_s25, %s1204_s20 }
  0xfb   : >> { %551 = vst [vmem:[%s869_s15 + $0x8] sm:$0xff] %v550_v22 }
  0xfc   : >> { %553 = vst [vmem:[%s869_s15 + $0x10] sm:$0xff] %v552_v23  ;;  %s1265_s26 = smov (%p561_p11, %s560_s26), 0  ;;  %544 = sbr.rel (!%p541_p12) target bundleno = 249 (0xf9), region = 122 }
  0xfd   : >> { %555 = vst [vmem:[%s869_s15 + $0x18] sm:$0xff] %v554_v24  ;;  %s563_s24 = smul.u32 48, %s1265_s26  ;;  %s1258_s23 = smov %s1265_s26 }
  0xfe   : >> { %557 = vst [vmem:[%s869_s15 + $0x20] sm:$0xff] %v556_v25 }
  0xff   : >> { %559 = vst [vmem:[%s869_s15 + $0x28] sm:$0xff] %v558_v26  ;;  %s565_s8 = scalar_lea.vmem %s1183_s10, %s563_s24 [#allocation2]   ;;  %s566_s15 = scalar_lea.vmem %s1198_s18, %s563_s24  }
 0x101 PF: > { %808 = sdivrem.u32 %s1263_s12, 6 }
 0x102   : > { %s705_s28 = smul.u32 48, %s1204_s20 }
 0x104   : > { %s1236_s29 = scalar_lea.vmem %s1183_s10, %s705_s28 [#allocation2]   ;;  %s573_s30 = scalar_lea.vmem %s1198_s18, %s705_s28  }
 0x10a   : > { %s809_s4 = spop.drf %808 }
 0x10b   : > { %s810_s5 = spop.drf %808 }
 0x10c   : > { %p707_p13 = scmp.le.s32.totalorder %s810_s5, 0 }
 0x10d   : > { %s883_s6 = smov (!%p707_p13), %s573_s30   ;;  %s887_s27 = smov (!%p707_p13), %s1236_s29  }
 0x10e   : > { %664 = sbr.rel (%p707_p13) target bundleno = 283 (0x11b), region = 127  ;;  %s891_s7 = smov (!%p707_p13), 0  }
 0x10f   : > { %s895_s9 = smov (!%p707_p13), 0  }
 0x113 LB: >> { %v583_v27 = vld [vmem:[%s889_s27] sm:$0xff]  ;;  %s585_s10 = sadd.s32 1, %s893_s7  ;;  %s577_s9 = sadd.s32 1, %s897_s9   ;;  %s897_s9 = sphi %s895_s9, %s577_s9   ;;  %s893_s7 = sphi %s891_s7, %s892_s7   ;;  %s889_s27 = sphi %s887_s27, %s590_s27   ;;  %s885_s6 = sphi %s883_s6, %s591_s6  }
 0x114   : >> { %584 = vst [vmem:[%s885_s6] sm:$0xff] %v583_v27  ;;  %p586_p0 = scmp.ge.s32.totalorder %s585_s10, %s810_s5  ;;  %p576_p1 = scmp.ge.s32.totalorder %s577_s9, %s810_s5 }
 0x116   : >> { %s1267_s10 = smov (%p586_p0, %s585_s10), 0  ;;  %579 = sbr.rel (!%p576_p1) target bundleno = 275 (0x113), region = 133 }
 0x117   : >> { %s708_s12 = sshll.u32 %s1267_s10, 3  ;;  %s892_s7 = smov %s1267_s10  }
 0x118   : >> { %s590_s27 = scalar_lea.vmem %s1236_s29, %s708_s12 [#allocation2]   ;;  %s591_s6 = scalar_lea.vmem %s573_s30, %s708_s12  }
 0x11b PF: > { %p10_p2 = scmp.ge.s32.totalorder %s934_s16, 4   ;;  %s1259_s12 = smov %s861_s13 }
 0x11c   : > { %s1260_s13 = smov %s942_s19  ;;  %s1261_s14 = smov %s934_s16 }
 0x11d   :  { %12 = sbr.rel (!%p10_p2) target bundleno = 2 (0x2), region = 144 }

</bundles_post_ra>
